<compile_context>
chip_gen: v7x
topology: tpu7x:2x2x1
jax: 0.10.0
libtpu: 0.0.40
codegen_flags: <defaults>
</compile_context>

<pallas_src>
import functools
import math

import jax
import jax.numpy as jnp
from jax.experimental import pallas as pl
from jax.experimental.pallas import tpu as pltpu


def _stl_and_or_kernel(x_ref, y_ref, o_ref, *, c1, c2, pscale, scale, op):
    """Fused kernel for And/Or(GreaterThan(x,c1), LessThan(y,c2)).

    op: 'and' -> Minish, 'or' -> Maxish.
    c1, c2, pscale, scale are Python floats (static, matching the PyTorch code
    where `scale` controls a Python-level branch).
    """
    x = x_ref[...]
    y = y_ref[...]

    # GreaterThan.robustness_trace / LessThan.robustness_trace
    trace1 = (x - c1) * pscale
    trace2 = (c2 - y) * pscale

    if scale > 0:
        # 2-element softmax identity: one sigmoid (EUP) instead of
        # 2 exp + 1 reciprocal + max.  Compute in f32 (v5e EUP has no bf16).
        t1 = trace1.astype(jnp.float32)
        t2 = trace2.astype(jnp.float32)
        sgn = -1.0 if op == "and" else 1.0
        d = t1 - t2
        w = jax.nn.sigmoid((sgn * scale) * d)
        o_ref[...] = (t2 + w * d).astype(o_ref.dtype)
    else:
        # true min / max
        if op == "and":
            o_ref[...] = jnp.minimum(trace1, trace2).astype(o_ref.dtype)
        else:
            o_ref[...] = jnp.maximum(trace1, trace2).astype(o_ref.dtype)


_COLS = 1024            # lane-dense last dim (multiple of 128)
_MAX_BLOCK_ROWS = 512   # 512 x 1024 f32 = 2 MiB per array per buffer


def _round_up(n, m):
    return -(-n // m) * m


def stl_formula_forward(x, y, *, c1, c2, pscale=1.0, scale=-1.0, op="and",
                        max_block_rows=_MAX_BLOCK_ROWS):
    """Forward pass of And/Or(GreaterThan('x', c1), LessThan('y', c2)).

    x, y: [batch, time_dim, x_dim] traces (any elementwise-compatible shape).
    Returns the robustness trace, same shape as x (Minish/Maxish with dim=-1,
    keepdim=False collapses the stacked pair of subformula traces).
    """
    assert x.shape == y.shape
    orig_shape = x.shape
    total = math.prod(orig_shape)

    # Flatten to a lane-dense [m_pad, _COLS] slab (pad with zeros; padding is
    # computed on garbage and sliced away below).
    m = max(1, -(-total // _COLS))
    tb = min(int(max_block_rows), _round_up(m, 8))     # rows per block, mult. of 8
    m_pad = _round_up(m, tb)
    grid_rows = m_pad // tb
    padded_total = m_pad * _COLS

    def to_slab(a):
        flat = a.reshape(-1)
        if padded_total != total:
            flat = jnp.pad(flat, (0, padded_total - total))
        return flat.reshape(m_pad, _COLS)

    x2 = to_slab(x)
    y2 = to_slab(y)

    kernel = functools.partial(
        _stl_and_or_kernel,
        c1=float(c1), c2=float(c2),
        pscale=float(pscale), scale=float(scale), op=op,
    )

    blk = pl.BlockSpec((tb, _COLS), lambda i: (i, 0))
    out2 = pl.pallas_call(
        kernel,
        out_shape=jax.ShapeDtypeStruct((m_pad, _COLS), x.dtype),
        grid=(grid_rows,),
        in_specs=[blk, blk],
        out_specs=blk,
        compiler_params=pltpu.CompilerParams(
            dimension_semantics=("parallel",),
        ),
    )(x2, y2)

    return out2.reshape(-1)[:total].reshape(orig_shape)


def _reference(x, y, c1, c2, pscale, scale, op):
    """Plain-JAX reference mirroring the PyTorch semantics exactly."""
    trace1 = (x - c1) * pscale
    trace2 = (c2 - y) * pscale
    xx = jnp.stack([trace1, trace2], axis=-1)
    if scale > 0:
        s = xx * scale if op == "or" else -xx * scale
        w = jax.nn.softmax(s, axis=-1)
        return jnp.sum(w * xx, axis=-1)
    if op == "and":
        return jnp.min(xx, axis=-1)
    return jnp.max(xx, axis=-1)


if __name__ == "__main__":
    key = jax.random.PRNGKey(0)
    kx, ky = jax.random.split(key)

    # small shapes consistent with the module: [batch, time_dim, x_dim]
    B, T, D = 2, 8, 4
    x = jax.random.normal(kx, (B, T, D), dtype=jnp.float32)
    y = jax.random.normal(ky, (B, T, D), dtype=jnp.float32)

    # deterministic "parameters" (the predicate constants c)
    c1, c2 = 0.25, -0.5
    pscale = 1.0

    ok = True
    for op in ("and", "or"):
        for scale in (-1.0, 2.0):  # hard min/max path and soft(min/max) path
            out = stl_formula_forward(
                x, y, c1=c1, c2=c2, pscale=pscale, scale=scale, op=op
            )
            out = jax.block_until_ready(out)
            ref = _reference(x, y, c1, c2, pscale, scale, op)
            if not jnp.allclose(out, ref, atol=1e-5, rtol=1e-5):
                ok = False

    # Exercise the multi-block grid path (forced small block) on a slightly
    # larger trace to validate the flattened tiling/padding logic.
    kx2, ky2 = jax.random.split(jax.random.PRNGKey(1))
    xb = jax.random.normal(kx2, (4, 128, 64), dtype=jnp.float32)
    yb = jax.random.normal(ky2, (4, 128, 64), dtype=jnp.float32)
    for op in ("and", "or"):
        for scale in (-1.0, 0.5):
            outb = stl_formula_forward(
                xb, yb, c1=c1, c2=c2, pscale=2.0, scale=scale, op=op,
                max_block_rows=8,
            )
            outb = jax.block_until_ready(outb)
            refb = _reference(xb, yb, c1, c2, 2.0, scale, op)
            if not jnp.allclose(outb, refb, atol=1e-5, rtol=1e-5):
                ok = False

    # robustness() slicing / eval_trace thresholding are trivial glue and are
    # done in plain JAX on the kernel output:
    trace = stl_formula_forward(x, y, c1=c1, c2=c2, op="and")
    robustness_at_t0 = trace[:, -1, :][:, None, :]   # [:, -(time+1), :].unsqueeze(1)
    eval_trace = trace > 0
    jax.block_until_ready(robustness_at_t0)
    jax.block_until_ready(eval_trace)

    if ok:
        print("KERNEL_OK")
</pallas_src>

<mosaic_0001>
module attributes {stable_mosaic.version = 11 : i64} {
  func.func @_stl_and_or_kernel(%arg0: i32, %arg1: memref<8x1024xf32, #tpu.memory_space<vmem>>, %arg2: memref<8x1024xf32, #tpu.memory_space<vmem>>, %arg3: memref<8x1024xf32, #tpu.memory_space<vmem>>) attributes {dimension_semantics = [#tpu.dimension_semantics<parallel>], iteration_bounds = array<i64: 1>, scalar_prefetch = 0 : i64, scratch_operands = 0 : i64, tpu.core_type = #tpu.core_type<tc>, window_params = [{transform_indices = @transform_0, window_bounds = array<i64: 8, 1024>}, {transform_indices = @transform_1, window_bounds = array<i64: 8, 1024>}, {transform_indices = @transform_2, window_bounds = array<i64: 8, 1024>}]} {
    %c0 = arith.constant 0 : index
    %c0_0 = arith.constant 0 : index
    %0 = vector.load %arg1[%c0, %c0_0] : memref<8x1024xf32, #tpu.memory_space<vmem>>, vector<8x1024xf32>
    %c0_1 = arith.constant 0 : index
    %c0_2 = arith.constant 0 : index
    %1 = vector.load %arg2[%c0_1, %c0_2] : memref<8x1024xf32, #tpu.memory_space<vmem>>, vector<8x1024xf32>
    %cst = arith.constant 2.500000e-01 : f32
    %2 = vector.broadcast %cst : f32 to vector<8x1024xf32>
    %3 = arith.subf %0, %2 : vector<8x1024xf32>
    %cst_3 = arith.constant 1.000000e+00 : f32
    %4 = vector.broadcast %cst_3 : f32 to vector<8x1024xf32>
    %5 = arith.mulf %3, %4 : vector<8x1024xf32>
    %cst_4 = arith.constant -5.000000e-01 : f32
    %6 = vector.broadcast %cst_4 : f32 to vector<8x1024xf32>
    %7 = arith.subf %6, %1 : vector<8x1024xf32>
    %cst_5 = arith.constant 1.000000e+00 : f32
    %8 = vector.broadcast %cst_5 : f32 to vector<8x1024xf32>
    %9 = arith.mulf %7, %8 : vector<8x1024xf32>
    %10 = arith.minimumf %5, %9 : vector<8x1024xf32>
    %c0_6 = arith.constant 0 : index
    %c0_7 = arith.constant 0 : index
    %11 = vector.load %arg3[%c0_6, %c0_7] : memref<8x1024xf32, #tpu.memory_space<vmem>>, vector<8x1024xf32>
    tpu.vector_store %arg3[%c0_6, %c0_7], %10 {strides = array<i32>} : memref<8x1024xf32, #tpu.memory_space<vmem>>, vector<8x1024xf32>,
    return
  }
  func.func @transform_0(%arg0: i32) -> (i32, i32) {
    %c0_i32 = arith.constant 0 : i32
    %c0_i32_0 = arith.constant 0 : i32
    return %arg0, %c0_i32 : i32, i32
  }
  func.func @transform_1(%arg0: i32) -> (i32, i32) {
    %c0_i32 = arith.constant 0 : i32
    %c0_i32_0 = arith.constant 0 : i32
    return %arg0, %c0_i32 : i32, i32
  }
  func.func @transform_2(%arg0: i32) -> (i32, i32) {
    %c0_i32 = arith.constant 0 : i32
    %c0_i32_0 = arith.constant 0 : i32
    return %arg0, %c0_i32 : i32, i32
  }
}

</mosaic_0001>

<bundles_post_ra>
// kernel: tpu_custom_call.1
= control target key start
LH: loop header
LB: loop body
LE: loop exit
PB: predicated region body
PF: predicated region fallthrough
CT: control target
= control target key end

     0   :  { %7 = vsyncpa [#allocation3], 0  ;;  %s237_s0 = inlined_call_operand.hbm [shape: f32[8,1024], index: 0, kind: input, shape index: {}]   ;;  %s238_s1 = inlined_call_operand.hbm [shape: f32[8,1024], index: 1, kind: input, shape index: {}]   ;;  %s239_s2 = inlined_call_operand.hbm [shape: f32[8,1024], index: 2, kind: output, shape index: {}]  }
   0x1   :  { %8 = vsyncpa [#allocation6], 0 }
   0x2   :  { %9 = vsyncpa [#allocation4], 0  ;;  %s183_s9 = smov [#allocation2]   ;;  %s184_s11 = smov [#allocation5]  }
   0x3   :  { %s16_s10 = sshll.u32 %s183_s9, 4  ;;  %s26_s12 = sshll.u32 %s184_s11, 4  ;;  %s17_s10 = int_to_ptr.vmem [resolvable:$true] %s16_s10  ;;  %s27_s12 = int_to_ptr.vmem [resolvable:$true] %s26_s12 }
   0x4   :  { %s111_s15 = scalar_lea.hbm %s237_s0, 1024 }
   0x5   :  { %p112_p0 = scmp.ne.s32.totalorder %s237_s0, %s111_s15  ;;  %p115_p1 = scmp.lt.u32.totalorder %s111_s15, %s237_s0 }
   0x7   :  { %p117_p2 = pnand %p115_p1, %p112_p0 }
   0x9   :  { %120 = shalt.err (!%p117_p2)
}
   0xa   :  { %s121_s20 = scalar_lea.vmem %s17_s10, 1024  ;;  %p126_p4 = scmp.lt.s32.totalorder %s17_s10, %s17_s10 }
   0xb   :  { %p122_p3 = scmp.ne.s32.totalorder %s17_s10, %s121_s20  ;;  %p127_p5 = scmp.lt.s32.totalorder %s121_s20, %s121_s20 }
   0xd   :  { %p128_p6 = por %p127_p5, %p126_p4 }
   0xf   :  { %p129_p7 = pnand %p128_p6, %p122_p3 }
  0x11   :  { %132 = shalt.err (!%p129_p7)
}
  0x12   :  { %19 = dma.hbm_to_vmem [thread:$0]  %s237_s0, 1024, %s17_s10, [#allocation3]  }
  0x13   :  { %s133_s25 = scalar_lea.hbm %s238_s1, 1024 }
  0x14   :  { %p134_p8 = scmp.ne.s32.totalorder %s238_s1, %s133_s25  ;;  %p137_p9 = scmp.lt.u32.totalorder %s133_s25, %s238_s1 }
  0x16   :  { %p139_p10 = pnand %p137_p9, %p134_p8 }
  0x18   :  { %142 = shalt.err (!%p139_p10)
}
  0x19   :  { %s143_s30 = scalar_lea.vmem %s27_s12, 1024  ;;  %p148_p12 = scmp.lt.s32.totalorder %s27_s12, %s27_s12 }
  0x1a   :  { %p144_p11 = scmp.ne.s32.totalorder %s27_s12, %s143_s30  ;;  %p149_p13 = scmp.lt.s32.totalorder %s143_s30, %s143_s30 }
  0x1c   :  { %p150_p0 = por %p149_p13, %p148_p12 }
  0x1e   :  { %p151_p1 = pnand %p150_p0, %p144_p11 }
  0x20   :  { %154 = shalt.err (!%p151_p1)
}
  0x21   :  { %29 = dma.hbm_to_vmem [thread:$0]  %s238_s1, 1024, %s27_s12, [#allocation6]  }
  0x22   :  { %177 = dma.done.wait [#allocation3], 1024  }
  0x23   :  { %178 = vsyncadd [#allocation3], 4294966272 }
  0x24   :  { %179 = dma.done.wait [#allocation6], 1024  }
  0x25   :  { %180 = vsyncadd [#allocation6], 4294966272  ;;  %v36_v0 = vld [vmem:[#allocation2] sm:$0xff]  ;;  %v37_v2 = vld [vmem:[#allocation2 + $0x8] sm:$0xff]  ;;  %s185_s1 = smov [#allocation7]  }
  0x26   :  { %v44_v1 = vld [vmem:[#allocation5] sm:$0xff]  ;;  %v100_v3 = vadd.f32 -0.25, %v36_v0  ;;  %v45_v5 = vld [vmem:[#allocation5 + $0x8] sm:$0xff]  ;;  %v101_v6 = vadd.f32 -0.25, %v37_v2  ;;  %v38_v7 = vld [vmem:[#allocation2 + $0x10] sm:$0xff]  ;;  %s90_s4 = sshll.u32 %s185_s1, 4  ;;  %s91_s4 = int_to_ptr.vmem [resolvable:$true] %s90_s4 }
  0x27   :  { %v60_v4 = vsub.f32 -0.5, %v44_v1  ;;  %v46_v8 = vld [vmem:[#allocation5 + $0x10] sm:$0xff]  ;;  %v61_v9 = vsub.f32 -0.5, %v45_v5  ;;  %v102_v10 = vadd.f32 -0.25, %v38_v7  ;;  %v39_v12 = vld [vmem:[#allocation2 + $0x18] sm:$0xff]  ;;  %v40_v14 = vld [vmem:[#allocation2 + $0x20] sm:$0xff]  ;;  %p160_p3 = scmp.lt.s32.totalorder %s91_s4, %s91_s4 }
  0x28   :  { %v62_v11 = vsub.f32 -0.5, %v46_v8  ;;  %v47_v13 = vld [vmem:[#allocation5 + $0x18] sm:$0xff]  ;;  %v103_v16 = vadd.f32 -0.25, %v39_v12  ;;  %v48_v18 = vld [vmem:[#allocation5 + $0x20] sm:$0xff]  ;;  %v104_v19 = vadd.f32 -0.25, %v40_v14  ;;  %v41_v20 = vld [vmem:[#allocation2 + $0x28] sm:$0xff] }
  0x29   :  { %v68_v15 = vmin.f32 %v100_v3, %v60_v4  ;;  %v63_v17 = vsub.f32 -0.5, %v47_v13  ;;  %v49_v21 = vld [vmem:[#allocation5 + $0x28] sm:$0xff]  ;;  %v69_v22 = vmin.f32 %v101_v6, %v61_v9  ;;  %v64_v24 = vsub.f32 -0.5, %v48_v18  ;;  %v42_v26 = vld [vmem:[#allocation2 + $0x30] sm:$0xff]  ;;  %v43_v28 = vld [vmem:[#allocation2 + $0x38] sm:$0xff]  ;;  %s155_s5 = scalar_lea.vmem %s91_s4, 1024 }
  0x2a   :  { %v70_v23 = vmin.f32 %v102_v10, %v62_v11  ;;  %v105_v25 = vadd.f32 -0.25, %v41_v20  ;;  %v50_v27 = vld [vmem:[#allocation5 + $0x30] sm:$0xff]  ;;  %v65_v30 = vsub.f32 -0.5, %v49_v21  ;;  %v106_v31 = vadd.f32 -0.25, %v42_v26  ;;  %v51_v33 = vld [vmem:[#allocation5 + $0x38] sm:$0xff]  ;;  %p156_p2 = scmp.ne.s32.totalorder %s91_s4, %s155_s5  ;;  %p161_p4 = scmp.lt.s32.totalorder %s155_s5, %s155_s5 }
  0x2b   :  { %76 = vst [vmem:[#allocation7] sm:$0xff] %v68_v15  ;;  %v71_v29 = vmin.f32 %v103_v16, %v63_v17  ;;  %v66_v32 = vsub.f32 -0.5, %v50_v27  ;;  %77 = vst [vmem:[#allocation7 + $0x8] sm:$0xff] %v69_v22  ;;  %v72_v34 = vmin.f32 %v104_v19, %v64_v24  ;;  %v107_v35 = vadd.f32 -0.25, %v43_v28 }
  0x2c   :  { %78 = vst [vmem:[#allocation7 + $0x10] sm:$0xff] %v70_v23  ;;  %v67_v36 = vsub.f32 -0.5, %v51_v33  ;;  %v73_v37 = vmin.f32 %v105_v25, %v65_v30  ;;  %p162_p5 = por %p161_p4, %p160_p3 }
  0x2d   :  { %79 = vst [vmem:[#allocation7 + $0x18] sm:$0xff] %v71_v29  ;;  %v74_v38 = vmin.f32 %v106_v31, %v66_v32  ;;  %80 = vst [vmem:[#allocation7 + $0x20] sm:$0xff] %v72_v34 }
  0x2e   :  { %v75_v39 = vmin.f32 %v107_v35, %v67_v36  ;;  %81 = vst [vmem:[#allocation7 + $0x28] sm:$0xff] %v73_v37  ;;  %p163_p6 = pnand %p162_p5, %p156_p2 }
  0x2f   :  { %82 = vst [vmem:[#allocation7 + $0x30] sm:$0xff] %v74_v38 }
  0x30   :  { %83 = vst [vmem:[#allocation7 + $0x38] sm:$0xff] %v75_v39 }
  0x31   :  { %166 = shalt.err (!%p163_p6)
}
  0x32   :  { %s167_s8 = scalar_lea.hbm %s239_s2, 1024 }
  0x33   :  { %p168_p7 = scmp.ne.s32.totalorder %s239_s2, %s167_s8  ;;  %p171_p8 = scmp.lt.u32.totalorder %s167_s8, %s239_s2 }
  0x35   :  { %p173_p9 = pnand %p171_p8, %p168_p7 }
  0x37   :  { %176 = shalt.err (!%p173_p9)
}
  0x38   :  { %93 = dma.vmem_to_hbm [thread:$0]  %s91_s4, 1024, %s239_s2, [#allocation4]  }
  0x39   :  { %181 = dma.done.wait [#allocation4], 1024  }
  0x3a   :  { %182 = vsyncadd [#allocation4], 4294966272 }
  0x3b   :  { %97 = vsyncpa [#allocation3], 1 }
  0x3c   :  { %98 = vsyncpa [#allocation6], 1 }
  0x3d   :  { %99 = vsyncpa [#allocation4], 1 }

</bundles_post_ra>
